<compile_context>
chip_gen: v5e
topology: v5e:2x2
jax: 0.10.0
libtpu: 0.0.40
codegen_flags: <defaults>
</compile_context>

<pallas_src>
import functools
import math

import jax
import jax.numpy as jnp
from jax.experimental import pallas as pl
from jax.experimental.pallas import tpu as pltpu

LANE = 128
SUBLANE = 8


def _round_up(n, m):
    return ((n + m - 1) // m) * m


def _pad2(x, shape):
    return jnp.pad(x, [(0, shape[0] - x.shape[0]), (0, shape[1] - x.shape[1])])


def _attention_head_kernel(
    enc_ref,   # (BB, S_enc_p, E_enc_p)  bf16
    dec_ref,   # (BB, S_dec_p, E_dec_p)  bf16
    wq_ref,    # (E_dec_p, KQ_p)         bf16, 1/sqrt(kq_dim) pre-folded
    bq_ref,    # (1, KQ_p)               f32,  scale pre-folded
    wkv_ref,   # (E_enc_p, KQ_p + V_p)   bf16, fused K|V projection
    bkv_ref,   # (1, KQ_p + V_p)         f32
    wo_ref,    # (V_p, E_dec_p)          bf16
    bo_ref,    # (1, E_dec_p)            f32
    out_ref,   # (BB, S_dec_p, E_dec_p)  f32
    *,
    kq_pad,
    s_enc_valid,
):
    bb, s_dec, e_dec_p = out_ref.shape
    _, s_enc, e_enc_p = enc_ref.shape

    # Flatten batch into the sublane dimension (S multiples of 8 -> free merge).
    dec2d = dec_ref[...].reshape(bb * s_dec, dec_ref.shape[-1])
    enc2d = enc_ref[...].reshape(bb * s_enc, e_enc_p)

    # Projections: bf16 operands, f32 MXU accumulation, f32 bias add.
    q2d = jnp.dot(dec2d, wq_ref[...], preferred_element_type=jnp.float32) + bq_ref[...]
    kv2d = jnp.dot(enc2d, wkv_ref[...], preferred_element_type=jnp.float32) + bkv_ref[...]
    k2d = kv2d[:, :kq_pad]            # lane-aligned slice (kq_pad % 128 == 0)
    v2d = kv2d[:, kq_pad:]
    v_pad = v2d.shape[-1]

    q = q2d.reshape(bb, s_dec, kq_pad).astype(jnp.bfloat16)
    k = k2d.reshape(bb, s_enc, kq_pad).astype(jnp.bfloat16)
    v = v2d.reshape(bb, s_enc, v_pad).astype(jnp.bfloat16)

    # scores[b, i, j] = sum_d q[b, i, d] * k[b, j, d]  (batched, no transpose
    # materialized, block-diagonal per batch so there is no cross-batch mix).
    scores = jax.lax.dot_general(
        q, k,
        dimension_numbers=(((2,), (2,)), ((0,), (0,))),
        preferred_element_type=jnp.float32,
    )

    # Mask padded encoder (key) columns: after the projection those rows hold
    # the bias, not zeros, so they must not enter the softmax denominator.
    if s_enc_valid < s_enc:
        col = jax.lax.broadcasted_iota(jnp.int32, scores.shape, 2)
        scores = jnp.where(col < s_enc_valid, scores, jnp.float32(-1e30))

    # Numerically stable softmax over the encoder axis (f32 throughout).
    m = jnp.max(scores, axis=-1, keepdims=True)
    e = jnp.exp(scores - m)
    denom = jnp.sum(e, axis=-1, keepdims=True)
    inv = pl.reciprocal(denom, approx=True)      # EUP slot
    inv = inv * (2.0 - denom * inv)              # one Newton step -> ~f32 exact
    attn = (e * inv).astype(jnp.bfloat16)

    # Attention-weighted values: (BB, S_dec_p, V_p), f32 accumulation.
    ctx = jax.lax.dot_general(
        attn, v,
        dimension_numbers=(((2,), (1,)), ((0,), (0,))),
        preferred_element_type=jnp.float32,
    )

    # Output projection on the flattened (BB*S_dec_p, V_p) context.
    ctx2d = ctx.reshape(bb * s_dec, v_pad).astype(jnp.bfloat16)
    res = jnp.dot(ctx2d, wo_ref[...], preferred_element_type=jnp.float32) + bo_ref[...]

    out_ref[...] = res.reshape(bb, s_dec, e_dec_p).astype(out_ref.dtype)


def _vmem_bytes_estimate(bb, s_enc_p, s_dec_p, e_enc_p, e_dec_p, kq_p, v_p):
    bf16, f32 = 2, 4
    act_in = bb * (s_enc_p * e_enc_p + s_dec_p * e_dec_p) * bf16
    act_out = bb * s_dec_p * e_dec_p * f32
    weights = (e_dec_p * kq_p + e_enc_p * (kq_p + v_p) + v_p * e_dec_p) * bf16 \
              + (kq_p + (kq_p + v_p) + e_dec_p) * f32
    inter = bb * (
        s_dec_p * kq_p + s_enc_p * (kq_p + v_p)        # q2d, kv2d
        + 2 * s_dec_p * s_enc_p                        # scores, exp
        + s_dec_p * v_p + s_dec_p * e_dec_p            # ctx, res
    ) * f32
    # double buffers for all pipelined operands (incl. constant-index weights)
    return 2 * (act_in + act_out + weights) + inter


def unmasked_attention_head(encoder_embeddings, decoder_embeddings, params,
                            kq_dim, *, batch_block=None):
    """params: dict with (in, out)-layout weights and (1, out) biases (unpadded, f32)."""
    B, S_enc, E_enc = encoder_embeddings.shape
    _, S_dec, E_dec = decoder_embeddings.shape
    KQ = params["wq"].shape[1]
    V = params["wv"].shape[1]

    E_enc_p, E_dec_p = _round_up(E_enc, LANE), _round_up(E_dec, LANE)
    KQ_p, V_p = _round_up(KQ, LANE), _round_up(V, LANE)
    S_enc_p, S_dec_p = _round_up(S_enc, SUBLANE), _round_up(S_dec, SUBLANE)

    # --- batch tiling: at least a few grid steps so DMAs pipeline behind
    # compute and the parallel axis can shard across TensorCores; shrink the
    # block if the per-step VMEM estimate exceeds a v7x-safe budget.
    vmem_budget = 24 << 20
    if batch_block is None:
        batch_block = max(1, -(-B // 4))
        while batch_block > 1 and _vmem_bytes_estimate(
                batch_block, S_enc_p, S_dec_p, E_enc_p, E_dec_p, KQ_p, V_p) > vmem_budget:
            batch_block = -(-batch_block // 2)
    num_blocks = pl.cdiv(B, batch_block)
    B_pad = num_blocks * batch_block

    vmem_est = _vmem_bytes_estimate(batch_block, S_enc_p, S_dec_p,
                                    E_enc_p, E_dec_p, KQ_p, V_p)
    vmem_limit = int(min(max(2 * vmem_est, 16 << 20), 48 << 20))

    # Lane/sublane-dense zero-padded activations, pre-cast to bf16 (halves the
    # HBM read traffic; the MXU operands would be bf16 anyway).  Padded batch /
    # decoder rows produce finite garbage that is sliced off below; padded
    # encoder rows are neutralized by the in-kernel score mask.
    enc_p = jnp.pad(encoder_embeddings,
                    [(0, B_pad - B), (0, S_enc_p - S_enc), (0, E_enc_p - E_enc)]
                    ).astype(jnp.bfloat16)
    dec_p = jnp.pad(decoder_embeddings,
                    [(0, B_pad - B), (0, S_dec_p - S_dec), (0, E_dec_p - E_dec)]
                    ).astype(jnp.bfloat16)

    scale = 1.0 / math.sqrt(kq_dim)
    wq = _pad2(params["wq"] * scale, (E_dec_p, KQ_p)).astype(jnp.bfloat16)
    bq = _pad2(params["bq"] * scale, (1, KQ_p))
    wkv = jnp.concatenate([_pad2(params["wk"], (E_enc_p, KQ_p)),
                           _pad2(params["wv"], (E_enc_p, V_p))], axis=1
                          ).astype(jnp.bfloat16)
    bkv = jnp.concatenate([_pad2(params["bk"], (1, KQ_p)),
                           _pad2(params["bv"], (1, V_p))], axis=1)
    wo = _pad2(params["wo"], (V_p, E_dec_p)).astype(jnp.bfloat16)
    bo = _pad2(params["bo"], (1, E_dec_p))

    kernel = functools.partial(_attention_head_kernel,
                               kq_pad=KQ_p, s_enc_valid=S_enc)

    full = lambda shape: pl.BlockSpec(shape, lambda b: (0,) * len(shape))

    flops = 2 * B_pad * (
        S_dec_p * E_dec_p * KQ_p
        + S_enc_p * E_enc_p * (KQ_p + V_p)
        + S_dec_p * S_enc_p * KQ_p
        + S_dec_p * S_enc_p * V_p
        + S_dec_p * V_p * E_dec_p
    )
    transcendentals = B_pad * S_dec_p * (S_enc_p + 1)
    bytes_accessed = (2 * (enc_p.size + dec_p.size + wq.size + wkv.size + wo.size)
                      + 4 * (bq.size + bkv.size + bo.size
                             + B_pad * S_dec_p * E_dec_p))

    out = pl.pallas_call(
        kernel,
        out_shape=jax.ShapeDtypeStruct((B_pad, S_dec_p, E_dec_p), jnp.float32),
        grid_spec=pltpu.PrefetchScalarGridSpec(
            num_scalar_prefetch=0,
            grid=(num_blocks,),
            in_specs=[
                pl.BlockSpec((batch_block, S_enc_p, E_enc_p), lambda b: (b, 0, 0)),
                pl.BlockSpec((batch_block, S_dec_p, E_dec_p), lambda b: (b, 0, 0)),
                full((E_dec_p, KQ_p)),
                full((1, KQ_p)),
                full((E_enc_p, KQ_p + V_p)),
                full((1, KQ_p + V_p)),
                full((V_p, E_dec_p)),
                full((1, E_dec_p)),
            ],
            out_specs=pl.BlockSpec((batch_block, S_dec_p, E_dec_p),
                                   lambda b: (b, 0, 0)),
        ),
        compiler_params=pltpu.CompilerParams(
            dimension_semantics=("parallel",),
            vmem_limit_bytes=vmem_limit,
        ),
        cost_estimate=pl.CostEstimate(
            flops=flops,
            transcendentals=transcendentals,
            bytes_accessed=bytes_accessed,
        ),
    )(enc_p, dec_p, wq, bq, wkv, bkv, wo, bo)

    # Strip batch, sequence and lane padding.
    return out[:B, :S_dec, :E_dec]


def _reference(encoder_embeddings, decoder_embeddings, params, kq_dim):
    # Pure-JAX f32 reference matching the PyTorch forward.
    q = decoder_embeddings @ params["wq"] + params["bq"]
    k = encoder_embeddings @ params["wk"] + params["bk"]
    v = encoder_embeddings @ params["wv"] + params["bv"]
    scores = q @ jnp.swapaxes(k, -2, -1) / math.sqrt(kq_dim)
    attn = jax.nn.softmax(scores, axis=-1)
    ctx = attn @ v
    return ctx @ params["wo"] + params["bo"]


def _init_params(key, kq_dim, v_dim, enc_dim, dec_dim):
    # Deterministic init mimicking nn.Linear's uniform(-1/sqrt(in), 1/sqrt(in)).
    ks = jax.random.split(key, 8)

    def lin(kw, kb, fan_in, fan_out):
        bound = 1.0 / math.sqrt(fan_in)
        # Stored already transposed to (in, out); bias kept 2D (1, out) for TPU.
        w = jax.random.uniform(kw, (fan_in, fan_out), jnp.float32, -bound, bound)
        b = jax.random.uniform(kb, (1, fan_out), jnp.float32, -bound, bound)
        return w, b

    wq, bq = lin(ks[0], ks[1], dec_dim, kq_dim)
    wk, bk = lin(ks[2], ks[3], enc_dim, kq_dim)
    wv, bv = lin(ks[4], ks[5], enc_dim, v_dim)
    wo, bo = lin(ks[6], ks[7], v_dim, dec_dim)
    return {"wq": wq, "bq": bq, "wk": wk, "bk": bk,
            "wv": wv, "bv": bv, "wo": wo, "bo": bo}


if __name__ == "__main__":
    # Small, module-consistent shapes.
    B = 2
    S_enc, S_dec = 16, 8
    enc_dim, dec_dim = 32, 32
    kq_dim, v_dim = 16, 16

    key = jax.random.PRNGKey(0)
    k_enc, k_dec, k_par = jax.random.split(key, 3)

    encoder_embeddings = jax.random.normal(k_enc, (B, S_enc, enc_dim), jnp.float32)
    decoder_embeddings = jax.random.normal(k_dec, (B, S_dec, dec_dim), jnp.float32)
    params = _init_params(k_par, kq_dim, v_dim, enc_dim, dec_dim)

    out = unmasked_attention_head(encoder_embeddings, decoder_embeddings,
                                  params, kq_dim)
    out = jax.block_until_ready(out)

    ref = _reference(encoder_embeddings, decoder_embeddings, params, kq_dim)
    assert out.shape == (B, S_dec, dec_dim)
    # bf16 MXU operands (f32 accumulation) -> bf16-level tolerance vs f32 ref.
    assert jnp.allclose(out, ref, atol=3e-2, rtol=3e-2), "mismatch vs reference"

    print("KERNEL_OK")
</pallas_src>

<mosaic_0001>
module attributes {stable_mosaic.version = 11 : i64} {
  func.func @_attention_head_kernel(%arg0: i32, %arg1: memref<1x16x128xbf16, #tpu.memory_space<vmem>>, %arg2: memref<1x8x128xbf16, #tpu.memory_space<vmem>>, %arg3: memref<128x128xbf16, #tpu.memory_space<vmem>>, %arg4: memref<1x128xf32, #tpu.memory_space<vmem>>, %arg5: memref<128x256xbf16, #tpu.memory_space<vmem>>, %arg6: memref<1x256xf32, #tpu.memory_space<vmem>>, %arg7: memref<128x128xbf16, #tpu.memory_space<vmem>>, %arg8: memref<1x128xf32, #tpu.memory_space<vmem>>, %arg9: memref<1x8x128xf32, #tpu.memory_space<vmem>>) attributes {dimension_semantics = [#tpu.dimension_semantics<parallel>], iteration_bounds = array<i64: 2>, scalar_prefetch = 0 : i64, scratch_operands = 0 : i64, tpu.core_type = #tpu.core_type<tc>, window_params = [{transform_indices = @transform_0, window_bounds = array<i64: 1, 16, 128>}, {transform_indices = @transform_1, window_bounds = array<i64: 1, 8, 128>}, {pipeline_mode = #tpu.pipeline_mode<synchronous>, transform_indices = @transform_2, window_bounds = array<i64: 128, 128>}, {pipeline_mode = #tpu.pipeline_mode<synchronous>, transform_indices = @transform_3, window_bounds = array<i64: 1, 128>}, {pipeline_mode = #tpu.pipeline_mode<synchronous>, transform_indices = @transform_4, window_bounds = array<i64: 128, 256>}, {pipeline_mode = #tpu.pipeline_mode<synchronous>, transform_indices = @transform_5, window_bounds = array<i64: 1, 256>}, {pipeline_mode = #tpu.pipeline_mode<synchronous>, transform_indices = @transform_6, window_bounds = array<i64: 128, 128>}, {pipeline_mode = #tpu.pipeline_mode<synchronous>, transform_indices = @transform_7, window_bounds = array<i64: 1, 128>}, {transform_indices = @transform_8, window_bounds = array<i64: 1, 8, 128>}]} {
    %c0 = arith.constant 0 : index
    %c0_0 = arith.constant 0 : index
    %c0_1 = arith.constant 0 : index
    %0 = vector.load %arg2[%c0, %c0_0, %c0_1] : memref<1x8x128xbf16, #tpu.memory_space<vmem>>, vector<1x8x128xbf16>
    %1 = vector.shape_cast %0 : vector<1x8x128xbf16> to vector<8x128xbf16>
    %c0_2 = arith.constant 0 : index
    %c0_3 = arith.constant 0 : index
    %c0_4 = arith.constant 0 : index
    %2 = vector.load %arg1[%c0_2, %c0_3, %c0_4] : memref<1x16x128xbf16, #tpu.memory_space<vmem>>, vector<1x16x128xbf16>
    %3 = vector.shape_cast %2 : vector<1x16x128xbf16> to vector<16x128xbf16>
    %c0_5 = arith.constant 0 : index
    %c0_6 = arith.constant 0 : index
    %4 = vector.load %arg3[%c0_5, %c0_6] : memref<128x128xbf16, #tpu.memory_space<vmem>>, vector<128x128xbf16>
    %cst = arith.constant dense<0.000000e+00> : vector<8x128xf32>
    %5 = tpu.matmul %1, %4, %cst {dimension_numbers = #tpu.dot_dimension_numbers<[1], [0], [0], [1], [0, 0, 1, 1], [], []>} : vector<8x128xbf16>, vector<128x128xbf16>, vector<8x128xf32> -> vector<8x128xf32>
    %c0_7 = arith.constant 0 : index
    %c0_8 = arith.constant 0 : index
    %6 = vector.load %arg4[%c0_7, %c0_8] : memref<1x128xf32, #tpu.memory_space<vmem>>, vector<1x128xf32>
    %7 = vector.broadcast %6 : vector<1x128xf32> to vector<8x128xf32>
    %8 = arith.addf %5, %7 : vector<8x128xf32>
    %c0_9 = arith.constant 0 : index
    %c0_10 = arith.constant 0 : index
    %9 = vector.load %arg5[%c0_9, %c0_10] : memref<128x256xbf16, #tpu.memory_space<vmem>>, vector<128x256xbf16>
    %cst_11 = arith.constant dense<0.000000e+00> : vector<16x256xf32>
    %10 = tpu.matmul %3, %9, %cst_11 {dimension_numbers = #tpu.dot_dimension_numbers<[1], [0], [0], [1], [0, 0, 1, 1], [], []>} : vector<16x128xbf16>, vector<128x256xbf16>, vector<16x256xf32> -> vector<16x256xf32>
    %c0_12 = arith.constant 0 : index
    %c0_13 = arith.constant 0 : index
    %11 = vector.load %arg6[%c0_12, %c0_13] : memref<1x256xf32, #tpu.memory_space<vmem>>, vector<1x256xf32>
    %12 = vector.broadcast %11 : vector<1x256xf32> to vector<16x256xf32>
    %13 = arith.addf %10, %12 : vector<16x256xf32>
    %14 = vector.extract_strided_slice %13 {offsets = [0, 0], sizes = [16, 128], strides = [1, 1]} : vector<16x256xf32> to vector<16x128xf32>
    %15 = vector.extract_strided_slice %13 {offsets = [0, 128], sizes = [16, 128], strides = [1, 1]} : vector<16x256xf32> to vector<16x128xf32>
    %16 = vector.shape_cast %8 : vector<8x128xf32> to vector<1x8x128xf32>
    %17 = arith.truncf %16 : vector<1x8x128xf32> to vector<1x8x128xbf16>
    %18 = vector.shape_cast %14 : vector<16x128xf32> to vector<1x16x128xf32>
    %19 = arith.truncf %18 : vector<1x16x128xf32> to vector<1x16x128xbf16>
    %20 = vector.shape_cast %15 : vector<16x128xf32> to vector<1x16x128xf32>
    %21 = arith.truncf %20 : vector<1x16x128xf32> to vector<1x16x128xbf16>
    %cst_14 = arith.constant dense<0.000000e+00> : vector<1x8x16xf32>
    %22 = tpu.matmul %17, %19, %cst_14 {dimension_numbers = #tpu.dot_dimension_numbers<[2], [2], [1], [1], [0, 0, 0, 1, 1, 1], [0], [0]>} : vector<1x8x128xbf16>, vector<1x16x128xbf16>, vector<1x8x16xf32> -> vector<1x8x16xf32>
    %cst_15 = arith.constant dense<0xFF800000> : vector<1x8xf32>
    %23 = vector.multi_reduction <maximumf>, %22, %cst_15 [2] : vector<1x8x16xf32> to vector<1x8xf32>
    %24 = vector.shape_cast %23 : vector<1x8xf32> to vector<1x8x1xf32>
    %25 = vector.broadcast %24 : vector<1x8x1xf32> to vector<1x8x16xf32>
    %26 = arith.subf %22, %25 : vector<1x8x16xf32>
    %27 = math.exp %26 : vector<1x8x16xf32>
    %cst_16 = arith.constant dense<0.000000e+00> : vector<1x8xf32>
    %28 = vector.multi_reduction <add>, %27, %cst_16 [2] : vector<1x8x16xf32> to vector<1x8xf32>
    %29 = vector.shape_cast %28 : vector<1x8xf32> to vector<1x8x1xf32>
    %30 = tpu.reciprocal %29 {approx = true} : vector<1x8x1xf32> -> vector<1x8x1xf32>
    %31 = arith.mulf %29, %30 : vector<1x8x1xf32>
    %cst_17 = arith.constant 2.000000e+00 : f32
    %32 = vector.broadcast %cst_17 : f32 to vector<1x8x1xf32>
    %33 = arith.subf %32, %31 : vector<1x8x1xf32>
    %34 = arith.mulf %30, %33 : vector<1x8x1xf32>
    %35 = vector.broadcast %34 : vector<1x8x1xf32> to vector<1x8x16xf32>
    %36 = arith.mulf %27, %35 : vector<1x8x16xf32>
    %37 = arith.truncf %36 : vector<1x8x16xf32> to vector<1x8x16xbf16>
    %cst_18 = arith.constant dense<0.000000e+00> : vector<1x8x128xf32>
    %38 = tpu.matmul %37, %21, %cst_18 {dimension_numbers = #tpu.dot_dimension_numbers<[2], [1], [1], [2], [0, 0, 0, 1, 1, 2], [0], [0]>} : vector<1x8x16xbf16>, vector<1x16x128xbf16>, vector<1x8x128xf32> -> vector<1x8x128xf32>
    %39 = vector.shape_cast %38 : vector<1x8x128xf32> to vector<8x128xf32>
    %40 = arith.truncf %39 : vector<8x128xf32> to vector<8x128xbf16>
    %c0_19 = arith.constant 0 : index
    %c0_20 = arith.constant 0 : index
    %41 = vector.load %arg7[%c0_19, %c0_20] : memref<128x128xbf16, #tpu.memory_space<vmem>>, vector<128x128xbf16>
    %cst_21 = arith.constant dense<0.000000e+00> : vector<8x128xf32>
    %42 = tpu.matmul %40, %41, %cst_21 {dimension_numbers = #tpu.dot_dimension_numbers<[1], [0], [0], [1], [0, 0, 1, 1], [], []>} : vector<8x128xbf16>, vector<128x128xbf16>, vector<8x128xf32> -> vector<8x128xf32>
    %c0_22 = arith.constant 0 : index
    %c0_23 = arith.constant 0 : index
    %43 = vector.load %arg8[%c0_22, %c0_23] : memref<1x128xf32, #tpu.memory_space<vmem>>, vector<1x128xf32>
    %44 = vector.broadcast %43 : vector<1x128xf32> to vector<8x128xf32>
    %45 = arith.addf %42, %44 : vector<8x128xf32>
    %46 = vector.shape_cast %45 : vector<8x128xf32> to vector<1x8x128xf32>
    %c0_24 = arith.constant 0 : index
    %c0_25 = arith.constant 0 : index
    %c0_26 = arith.constant 0 : index
    %47 = vector.load %arg9[%c0_24, %c0_25, %c0_26] : memref<1x8x128xf32, #tpu.memory_space<vmem>>, vector<1x8x128xf32>
    tpu.vector_store %arg9[%c0_24, %c0_25, %c0_26], %46 {strides = array<i32>} : memref<1x8x128xf32, #tpu.memory_space<vmem>>, vector<1x8x128xf32>,
    return
  }
  func.func @transform_0(%arg0: i32) -> (i32, i32, i32) {
    %c0_i32 = arith.constant 0 : i32
    %c0_i32_0 = arith.constant 0 : i32
    %c0_i32_1 = arith.constant 0 : i32
    return %arg0, %c0_i32, %c0_i32_0 : i32, i32, i32
  }
  func.func @transform_1(%arg0: i32) -> (i32, i32, i32) {
    %c0_i32 = arith.constant 0 : i32
    %c0_i32_0 = arith.constant 0 : i32
    %c0_i32_1 = arith.constant 0 : i32
    return %arg0, %c0_i32, %c0_i32_0 : i32, i32, i32
  }
  func.func @transform_2(%arg0: i32) -> (i32, i32) {
    %c0_i32 = arith.constant 0 : i32
    %c0_i32_0 = arith.constant 0 : i32
    %c0_i32_1 = arith.constant 0 : i32
    return %c0_i32, %c0_i32_0 : i32, i32
  }
  func.func @transform_3(%arg0: i32) -> (i32, i32) {
    %c0_i32 = arith.constant 0 : i32
    %c0_i32_0 = arith.constant 0 : i32
    %c0_i32_1 = arith.constant 0 : i32
    return %c0_i32, %c0_i32_0 : i32, i32
  }
  func.func @transform_4(%arg0: i32) -> (i32, i32) {
    %c0_i32 = arith.constant 0 : i32
    %c0_i32_0 = arith.constant 0 : i32
    %c0_i32_1 = arith.constant 0 : i32
    return %c0_i32, %c0_i32_0 : i32, i32
  }
  func.func @transform_5(%arg0: i32) -> (i32, i32) {
    %c0_i32 = arith.constant 0 : i32
    %c0_i32_0 = arith.constant 0 : i32
    %c0_i32_1 = arith.constant 0 : i32
    return %c0_i32, %c0_i32_0 : i32, i32
  }
  func.func @transform_6(%arg0: i32) -> (i32, i32) {
    %c0_i32 = arith.constant 0 : i32
    %c0_i32_0 = arith.constant 0 : i32
    %c0_i32_1 = arith.constant 0 : i32
    return %c0_i32, %c0_i32_0 : i32, i32
  }
  func.func @transform_7(%arg0: i32) -> (i32, i32) {
    %c0_i32 = arith.constant 0 : i32
    %c0_i32_0 = arith.constant 0 : i32
    %c0_i32_1 = arith.constant 0 : i32
    return %c0_i32, %c0_i32_0 : i32, i32
  }
  func.func @transform_8(%arg0: i32) -> (i32, i32, i32) {
    %c0_i32 = arith.constant 0 : i32
    %c0_i32_0 = arith.constant 0 : i32
    %c0_i32_1 = arith.constant 0 : i32
    return %arg0, %c0_i32, %c0_i32_0 : i32, i32, i32
  }
}

</mosaic_0001>

<bundles_post_ra>
// kernel: tpu_custom_call.1
= control target key start
LH: loop header
LB: loop body
LE: loop exit
PB: predicated region body
PF: predicated region fallthrough
CT: control target
= control target key end

     0   :  { %s1705_s0 = inlined_call_operand.hbm [shape: bf16[2,16,128], index: 0, kind: input, shape index: {}]   ;;  %s1706_s1 = inlined_call_operand.hbm [shape: bf16[2,8,128], index: 1, kind: input, shape index: {}]   ;;  %s1707_s2 = inlined_call_operand.hbm [shape: bf16[128,128], index: 2, kind: input, shape index: {}]   ;;  %s1708_s3 = inlined_call_operand.vmem [shape: f32[1,128], index: 3, kind: input, shape index: {}]   ;;  %s1709_s4 = inlined_call_operand.hbm [shape: bf16[128,256], index: 4, kind: input, shape index: {}]   ;;  %s1710_s5 = inlined_call_operand.vmem [shape: f32[1,256], index: 5, kind: input, shape index: {}]   ;;  %s1711_s6 = inlined_call_operand.hbm [shape: bf16[128,128], index: 6, kind: input, shape index: {}]   ;;  %s1712_s7 = inlined_call_operand.vmem [shape: f32[1,128], index: 7, kind: input, shape index: {}]   ;;  %s1713_s8 = inlined_call_operand.hbm [shape: f32[2,8,128], index: 8, kind: output, shape index: {}]  }
   0x1   :  { %1720 = sst [smem:[#allocation21_spill]] %s1707_s2 }
   0x2   :  { %1721 = sst [smem:[#allocation22_spill]] %s1709_s4 }
   0x3   :  { %1722 = sst [smem:[#allocation23_spill]] %s1711_s6 }
   0x4   :  { %13 = vsyncpa [#allocation3], 0 }
   0x5   :  { %15 = vsyncpa [#allocation3 + $0x1], 0 }
   0x6   :  { %16 = vsyncpa [#allocation6], 0 }
   0x7   :  { %18 = vsyncpa [#allocation6 + $0x1], 0 }
   0x8   :  { %19 = vsyncpa [#allocation9], 0 }
   0x9   :  { %20 = vsyncpa [#allocation4], 0 }
   0xa   :  { %22 = vsyncpa [#allocation4 + $0x1], 0  ;;  %s1480_s27 = smov 0   ;;  %s1482_s28 = smov 0  }
   0xb   :  { %s1484_s29 = smov 0   ;;  %s1486_s30 = smov 0  }
   0xc LB: > { %1723 = sst [smem:[#allocation17_spill]] %s1422_s29  ;;  %s1501_s9 = sadd.s32 4294967295, %s1426_s30   ;;  %s1426_s30 = sphi %s1486_s30, %s1740_s30   ;;  %s1422_s29 = sphi %s1484_s29, %s1742_s29   ;;  %s1418_s28 = sphi %s1482_s28, %s1744_s28   ;;  %s1414_s27 = sphi %s1480_s27, %s1743_s27  }
   0xd   : > { %s917_s10 = sadd.s32 4294967294, %s1426_s30   ;;  %p48_p0 = scmp.ne.s32.totalorder %s1418_s28, %s1414_s27 }
   0xe   : > { %p49_p1 = scmp.eq.s32.totalorder %s1501_s9, 0  ;;  %p224_p2 = scmp.eq.s32.totalorder %s1501_s9, 1 }
   0xf   : > { %p230_p3 = scmp.eq.s32.totalorder %s917_s10, 1  ;;  %p918_p5 = scmp.ge.s32.totalorder %s1426_s30, 1 }
  0x10   : > { %p1510_p4 = por %p49_p1, %p48_p0  ;;  %p237_p7 = scmp.lt.s32.totalorder %s1426_s30, 3 }
  0x11   : > { %p1515_p6 = por %p230_p3, %p48_p0  ;;  %s1727_s2 = sld [smem:[#allocation21_spill]] }
  0x12   : > { %p1523_p8 = pnand %p918_p5, %p237_p7  ;;  %s1428_s17 = smov [#allocation7]  }
  0x13   : > { %s1725_s12 = scalar_select %p1515_p6, 1, 0 }
  0x14   : > { %p1124_p9 = pneg %p1523_p8  ;;  %s250_s18 = sshll.u32 %s1428_s17, 4  ;;  %s251_s18 = int_to_ptr.vmem [resolvable:$true] %s250_s18 }
  0x15   : > { %1726 = sst [smem:[#allocation18_spill]] %s1725_s12  ;;  %s1714_s23 = smov 64  }
  0x16   : > { %p1531_p10 = pnand %p1124_p9, %p49_p1  ;;  %s1730_s4 = sld [smem:[#allocation22_spill]] }
  0x17   : > { %s248_s15 = sshll.u32 %s1727_s2, 4  ;;  %s1715_s24 = smov 4   ;;  %s249_s15 = int_to_ptr.hbm [resolvable:$true] %s248_s15 }
  0x18   : > { %1127 = dma.hbm_to_vmem [thread:$0]  (!%p1531_p10), %s249_s15, 1024, %s251_s18, [#allocation6], %s1714_s23, %s1714_s23, %s1715_s24  }
  0x19   : > { %s1431_s25 = smov [#allocation8]   ;;  %s1432_s10 = smov 128  }
  0x1a   : > { %s267_s26 = sshll.u32 %s1431_s25, 4  ;;  %s1433_s13 = smov 8   ;;  %s268_s26 = int_to_ptr.vmem [resolvable:$true] %s267_s26 }
  0x1b   : > { %s1731_s6 = sld [smem:[#allocation23_spill]]  ;;  %s1434_s15 = smov [#allocation10]  }
  0x1c   : > { %s265_s22 = sshll.u32 %s1730_s4, 4  ;;  %s284_s18 = sshll.u32 %s1434_s15, 4  ;;  %s266_s22 = int_to_ptr.hbm [resolvable:$true] %s265_s22  ;;  %s285_s18 = int_to_ptr.vmem [resolvable:$true] %s284_s18 }
  0x1d   : > { %1130 = dma.hbm_to_vmem [thread:$0]  (!%p1531_p10), %s266_s22, 2048, %s268_s26, [#allocation9], %s1432_s10, %s1432_s10, %s1433_s13  }
  0x1e   : > { %s1555_s21 = sadd.s32 1, %s1426_s30   ;;  %s35_s25 = sadd.s32 1, %s1422_s29 }
  0x1f   : > { %1732 = sst [smem:[#allocation19_spill]] %s1555_s21  ;;  %s32_s22 = ssub.s32 %s1426_s30, %s1555_s21 }
  0x20   : > { %p33_p12 = scmp.eq.s32.totalorder %s32_s22, 0  ;;  %p42_p13 = scmp.ne.s32.totalorder %s1422_s29, %s1418_s28 }
  0x21   : > { %s282_s20 = sshll.u32 %s1731_s6, 4  ;;  %p43_p0 = scmp.eq.s32.totalorder %s1426_s30, 0  ;;  %s283_s20 = int_to_ptr.hbm [resolvable:$true] %s282_s20 }
  0x22   : > { %1133 = dma.hbm_to_vmem [thread:$0]  (!%p1531_p10), %s283_s20, 1024, %s285_s18, [#allocation9], %s1714_s23, %s1714_s23, %s1715_s24  }
  0x23   : > { %p1148_p3 = scmp.lt.s32.totalorder %s1426_s30, 2  ;;  %p44_p5 = por %p43_p0, %p42_p13 }
  0x24   : > { %s1565_s26 = scalar_select %p33_p12, %s1422_s29, %s35_s25  }
  0x25   : > { %p1569_p7 = por %p224_p2, %p42_p13  ;;  %s1574_s10 = sand.u32 1, %s1422_s29  }
  0x26   : > { %1733 = sst [smem:[#allocation20_spill]] %s1565_s26  ;;  %s1072_s13 = sshll.u32 %s1426_s30, 3 }
  0x27   : > { %s923_s14 = sshll.u32 %s1574_s10, 3  ;;  %s310_s15 = scalar_lea.hbm %s1705_s0, %s1072_s13 }
  0x28   : > { %s311_s18 = sshll.u32 %s310_s15, 4  ;;  %s305_s22 = scalar_lea.vmem [#allocation2], %s923_s14  ;;  %s312_s18 = int_to_ptr.hbm [resolvable:$true] %s311_s18 }
  0x29   : > { %s313_s25 = sshll.u32 %s305_s22, 4  ;;  %p1583_p2 = pnand %p1148_p3, %p44_p5  ;;  %s314_s25 = int_to_ptr.vmem [resolvable:$true] %s313_s25 }
  0x2a   : > { %s323_s24 = sand.u32 1, %s1426_s30   ;;  %s926_s2 = sshll.u32 %s1574_s10, 2 }
  0x2b   : > { %s302_s4 = scalar_lea.sflag [#allocation3], %s1574_s10  ;;  %s1288_s6 = sshra.s32 %s312_s18, 4  ;;  %s1289_s6 = int_to_ptr.hbm [resolvable:$true] %s1288_s6 }
  0x2c   : > { %s1290_s26 = scalar_lea.hbm %s1289_s6, 8  ;;  %p1292_p10 = pneg %p1583_p2 }
  0x2d   : > { %p1291_p9 = scmp.ne.s32.totalorder %s1289_s6, %s1290_s26  ;;  %s1295_s17 = scalar_lea.hbm %s1705_s0, 16 }
  0x2e   : > { %p1296_p0 = scmp.lt.s32.totalorder %s1289_s6, %s1705_s0  ;;  %p1297_p3 = scmp.lt.s32.totalorder %s1295_s17, %s1290_s26 }
  0x2f   : > { %p1293_p12 = pnand %p1292_p10, %p1291_p9 }
  0x30   : > { %p1298_p5 = por %p1297_p3, %p1296_p0 }
  0x31   : > { %p1294_p13 = pneg %p1293_p12 }
  0x33   : > { %p1299_p11 = pnand %p1298_p5, %p1294_p13 }
  0x35   : > { %1302 = shalt.err (!%p1299_p11)
}
  0x36   : > { %s1736_s10 = smov 4   ;;  %s1737_s22 = smov 64  }
  0x37   : > { %1137 = dma.hbm_to_vmem [thread:$0]  (!%p1583_p2), %s312_s18, 128, %s314_s25, %s302_s4, %s1737_s22, %s1737_s22, %s1736_s10  }
  0x38   : > { %s927_s29 = sshll.u32 %s1426_s30, 2  ;;  %s327_s21 = scalar_lea.vmem [#allocation5], %s926_s2 }
  0x39   : > { %s335_s13 = sshll.u32 %s327_s21, 4  ;;  %s331_s20 = scalar_lea.hbm %s1706_s1, %s927_s29  ;;  %s336_s13 = int_to_ptr.vmem [resolvable:$true] %s335_s13 }
  0x3a   : > { %s333_s6 = sshll.u32 %s331_s20, 4  ;;  %s324_s26 = scalar_lea.sflag [#allocation6], %s323_s24  ;;  %s334_s6 = int_to_ptr.hbm [resolvable:$true] %s333_s6 }
  0x3b   : > { %s1318_s17 = sshra.s32 %s334_s6, 4  ;;  %s1325_s2 = scalar_lea.hbm %s1706_s1, 8  ;;  %s1319_s17 = int_to_ptr.hbm [resolvable:$true] %s1318_s17 }
  0x3c   : > { %s1320_s15 = scalar_lea.hbm %s1319_s17, 4  ;;  %p1326_p13 = scmp.lt.s32.totalorder %s1319_s17, %s1706_s1 }
  0x3d   : > { %p1321_p11 = scmp.ne.s32.totalorder %s1319_s17, %s1320_s15  ;;  %p1327_p0 = scmp.lt.s32.totalorder %s1325_s2, %s1320_s15 }
  0x3f   : > { %p1323_p9 = pnand %p1321_p11, %p1292_p10  ;;  %p1328_p3 = por %p1327_p0, %p1326_p13 }
  0x41   : > { %p1324_p12 = pneg %p1323_p9 }
  0x43   : > { %p1329_p5 = pnand %p1328_p3, %p1324_p12 }
  0x45   : > { %1332 = shalt.err (!%p1329_p5)
}
  0x46   : > { %1140 = dma.hbm_to_vmem [thread:$0]  (!%p1583_p2), %s334_s6, 64, %s336_s13, %s324_s26  }
  0x47   : > { %344 = sbr.rel (%p1523_p8) target bundleno = 929 (0x3a1), region = 52  ;;  %s1624_s29 = sand.u32 (!%p1523_p8), 1, %s1418_s28  }
  0x48   : > { %s929_s12 = sshll.u32 (!%p1523_p8), %s1624_s29, 3  ;;  %s347_s24 = scalar_lea.sflag (!%p1523_p8), [#allocation3], %s1624_s29 }
  0x49   : > { %s1630_s10 = scalar_lea.vmem (!%p1523_p8), [#allocation2], %s929_s12 }
  0x4c   : > { %1393 = dma.done.wait (%p1510_p4), %s347_s24, 128  }
  0x4d   : > { %1395 = vsyncadd (%p1510_p4), %s347_s24, 4294967168  ;;  %s356_s16 = sand.u32 1, %s1501_s9   ;;  %s930_s23 = sshll.u32 %s1624_s29, 2 }
  0x4e   : > { %s357_s22 = scalar_lea.sflag [#allocation6], %s356_s16  ;;  %s1638_s13 = scalar_lea.vmem [#allocation5], %s930_s23 }
  0x4f   : > { %1397 = dma.done.wait (%p1510_p4), %s357_s22, 64  }
  0x50   : > { %1399 = vsyncadd (%p1510_p4), %s357_s22, 4294967232 }
  0x51   : > { %1401 = dma.done.wait (%p49_p1), [#allocation6], 1024  }
  0x52   : > { %1403 = vsyncadd (%p49_p1), [#allocation6], 4294966272 }
  0x53   : > { %1405 = dma.done.wait (%p49_p1), [#allocation9], 3072  }
  0x54   : > { %1407 = vsyncadd (%p49_p1), [#allocation9], 4294964224  ;;  %v1029_v0 = vld [vmem:[#allocation8 + $0x70] sm:$0xf]  ;;  %v1097_v1 = vld [vmem:[#allocation8 + $0x74] sm:$0xf0] }
  0x55   : > { %v1021_v2 = vld [vmem:[#allocation8 + $0x60] sm:$0xf]  ;;  %v1030_v3 = vor.u32 %v1097_v1, %v1029_v0  ;;  %v1095_v4 = vld [vmem:[#allocation8 + $0x64] sm:$0xf0]  ;;  %v1081_v6 = vld [vmem:[#allocation7 + $0x38] sm:$0xff]  ;;  %vm659_vm0 = vcmask 130048  }
  0x56   : > { %v1022_v5 = vor.u32 %v1095_v4, %v1021_v2  ;;  %v1013_v7 = vld [vmem:[#allocation8 + $0x50] sm:$0xf]  ;;  %v1093_v8 = vld [vmem:[#allocation8 + $0x54] sm:$0xf0]  ;;  %486 = vmatpush.bf16.msra.mxu0 %v1081_v6  ;;  %v1005_v11 = vld [vmem:[#allocation8 + $0x40] sm:$0xf] }
  0x57   : > { %607 = vmatpush.bf16.msra.mxu1 %v1030_v3  ;;  %v1080_v9 = vld [vmem:[#allocation7 + $0x30] sm:$0xff]  ;;  %v1014_v10 = vor.u32 %v1093_v8, %v1013_v7  ;;  %v1091_v12 = vld [vmem:[#allocation8 + $0x44] sm:$0xf0]  ;;  %v1089_v16 = vld [vmem:[#allocation8 + $0x34] sm:$0xf0]  ;;  %s1069_s26 = sshll.u32 %s1501_s9, 3 }
  0x58   : > { %v1079_v13 = vld [vmem:[#allocation7 + $0x28] sm:$0xff]  ;;  %v1006_v14 = vor.u32 %v1091_v12, %v1005_v11  ;;  %v997_v15 = vld [vmem:[#allocation8 + $0x30] sm:$0xf]  ;;  %v1078_v17 = vld [vmem:[#allocation7 + $0x20] sm:$0xff]  ;;  %s791_s4 = scalar_lea.hbm %s1713_s8, %s1069_s26  ;;  %s413_s21 = scalar_lea.vmem [#allocation11], %s929_s12 }
  0x59   : > { %v998_v18 = vor.u32 %v1089_v16, %v997_v15  ;;  %v989_v19 = vld [vmem:[#allocation8 + $0x20] sm:$0xf]  ;;  %v1087_v20 = vld [vmem:[#allocation8 + $0x24] sm:$0xf0]  ;;  %v1077_v21 = vld [vmem:[#allocation7 + $0x18] sm:$0xff]  ;;  %s793_s25 = sshll.u32 %s413_s21, 4  ;;  %s794_s25 = int_to_ptr.vmem [resolvable:$true] %s793_s25 }
  0x5a   : > { %487 = vmatpush.bf16.msra.mxu0 %v1080_v9  ;;  %v990_v22 = vor.u32 %v1087_v20, %v989_v19  ;;  %v981_v23 = vld [vmem:[#allocation8 + $0x10] sm:$0xf]  ;;  %v1085_v24 = vld [vmem:[#allocation8 + $0x14] sm:$0xf0]  ;;  %v973_v27 = vld [vmem:[#allocation8] sm:$0xf] }
  0x5b   : > { %608 = vmatpush.bf16.msra.mxu1 %v1022_v5  ;;  %v1076_v25 = vld [vmem:[#allocation7 + $0x10] sm:$0xff]  ;;  %v982_v26 = vor.u32 %v1085_v24, %v981_v23  ;;  %v1083_v28 = vld [vmem:[#allocation8 + $0x4] sm:$0xf0]  ;;  %v1074_v31 = vld [vmem:[#allocation7] sm:$0xff]  ;;  %s795_s24 = sshll.u32 %s791_s4, 4  ;;  %s796_s24 = int_to_ptr.hbm [resolvable:$true] %s795_s24 }
  0x5c   : > { %v1075_v29 = vld [vmem:[#allocation7 + $0x8] sm:$0xff]  ;;  %v974_v30 = vor.u32 %v1083_v28, %v973_v27  ;;  %v415_v33 = vld [vmem:[%s1638_s13] sm:$0xf]  ;;  %v1096_v50 = vld [vmem:[#allocation8 + $0x74] sm:$0xf]  ;;  %s1362_s9 = sshra.s32 %s796_s24, 4  ;;  %s1363_s9 = int_to_ptr.hbm [resolvable:$true] %s1362_s9 }
  0x5d   : > { %v1073_v32 = vld [vmem:[%s1630_s10] sm:$0xff]  ;;  %v1031_v51 = vld [vmem:[#allocation8 + $0x78] sm:$0xf0]  ;;  %v1094_v52 = vld [vmem:[#allocation8 + $0x64] sm:$0xf]  ;;  %s781_s10 = scalar_lea.sflag [#allocation4], %s1624_s29  ;;  %p1369_p2 = scmp.lt.s32.totalorder %s1363_s9, %s1713_s8 }
  0x5e   : > { %488 = vmatpush.bf16.msra.mxu0 %v1079_v13  ;;  %v1657_v34 = vld [vmem:[%s1710_s5] sm:$0x3]  ;;  %v1034_v53 = vor.u32 %v1096_v50, %v1031_v51  ;;  %v1023_v54 = vld [vmem:[#allocation8 + $0x68] sm:$0xf0]  ;;  %v1092_v56 = vld [vmem:[#allocation8 + $0x54] sm:$0xf] }
  0x5f   : > { %609 = vmatpush.bf16.msra.mxu1 %v1014_v10  ;;  %v517_v36 = vperm.slane %v1657_v34, 0  ;;  %v1192_v44 = vld [vmem:[%s1708_s3] ss:$0 sm:$0xff]  ;;  %v1026_v55 = vor.u32 %v1094_v52, %v1023_v54  ;;  %v1015_v57 = vld [vmem:[#allocation8 + $0x58] sm:$0xf0]  ;;  %v518_v19 = vperm.slane %v1657_v34, 1 }
  0x60   : > { %621 = vmatpush.bf16.msra.mxu2 %v1034_v53  ;;  %v1018_v58 = vor.u32 %v1092_v56, %v1015_v57  ;;  %v1090_v59 = vld [vmem:[#allocation8 + $0x44] sm:$0xf]  ;;  %v1007_v60 = vld [vmem:[#allocation8 + $0x48] sm:$0xf0]  ;;  %v1088_v62 = vld [vmem:[#allocation8 + $0x34] sm:$0xf] }
  0x61   : > { %v1010_v61 = vor.u32 %v1090_v59, %v1007_v60  ;;  %v999_v63 = vld [vmem:[#allocation8 + $0x38] sm:$0xf0]  ;;  %v1086_v1 = vld [vmem:[#allocation8 + $0x24] sm:$0xf]  ;;  %v991_v2 = vld [vmem:[#allocation8 + $0x28] sm:$0xf0] }
  0x62   : > { %489 = vmatpush.bf16.msra.mxu0 %v1078_v17  ;;  %v1002_v0 = vor.u32 %v1088_v62, %v999_v63  ;;  %v994_v3 = vor.u32 %v1086_v1, %v991_v2  ;;  %v1084_v4 = vld [vmem:[#allocation8 + $0x14] sm:$0xf]  ;;  %v983_v5 = vld [vmem:[#allocation8 + $0x18] sm:$0xf0]  ;;  %v1082_v8 = vld [vmem:[#allocation8 + $0x4] sm:$0xf] }
  0x63   : > { %610 = vmatpush.bf16.msra.mxu1 %v1006_v14  ;;  %v986_v6 = vor.u32 %v1084_v4, %v983_v5  ;;  %v975_v9 = vld [vmem:[#allocation8 + $0x8] sm:$0xf0]  ;;  %v1105_v28 = vld [vmem:[#allocation10 + $0x38] sm:$0xff]  ;;  %v1100_v34 = vld [vmem:[#allocation10 + $0x10] sm:$0xff]  ;;  %s1364_s16 = scalar_lea.hbm %s1363_s9, 8  ;;  %s1368_s13 = scalar_lea.hbm %s1713_s8, 16 }
  0x64   : > { %622 = vmatpush.bf16.msra.mxu2 %v1026_v55  ;;  %v978_v11 = vor.u32 %v1082_v8, %v975_v9  ;;  %p1365_p1 = scmp.ne.s32.totalorder %s1363_s9, %s1364_s16  ;;  %p1370_p10 = scmp.lt.s32.totalorder %s1368_s13, %s1364_s16 }
  0x66   : > { %490 = vmatpush.bf16.msra.mxu0 %v1077_v21  ;;  %p1366_p4 = pnand %p1365_p1, %p1569_p7  ;;  %p1371_p11 = por %p1370_p10, %p1369_p2 }
  0x67   : > { %611 = vmatpush.bf16.msra.mxu1 %v998_v18 }
  0x68   : > { %623 = vmatpush.bf16.msra.mxu2 %v1018_v58  ;;  %p1367_p8 = pneg %p1366_p4 }
  0x6a   : > { %491 = vmatpush.bf16.msra.mxu0 %v1076_v25  ;;  %p1372_p9 = pnand %p1371_p11, %p1367_p8 }
  0x6b   : > { %612 = vmatpush.bf16.msra.mxu1 %v990_v22 }
  0x6c   : > { %624 = vmatpush.bf16.msra.mxu2 %v1010_v61 }
  0x6e   : > { %492 = vmatpush.bf16.msra.mxu0 %v1075_v29  ;;  %v1104_v29 = vld [vmem:[#allocation10 + $0x30] sm:$0xff] }
  0x6f   : > { %613 = vmatpush.bf16.msra.mxu1 %v982_v26 }
  0x70   : > { %625 = vmatpush.bf16.msra.mxu2 %v1002_v0 }
  0x72   : > { %493 = vmatpush.bf16.msra.mxu0 %v1074_v31  ;;  %v1102_v31 = vld [vmem:[#allocation10 + $0x20] sm:$0xff] }
  0x73   : > { %614 = vmatpush.bf16.msra.mxu1 %v974_v30  ;;  %v1103_v30 = vld [vmem:[#allocation10 + $0x28] sm:$0xff] }
  0x74   : > { %626 = vmatpush.bf16.msra.mxu2 %v994_v3 }
  0x75   : > { %494 = vmatmul.bf16.vlgmr.msra.gmra.mxu0 %v415_v33  ;;  %v1101_v33 = vld [vmem:[#allocation10 + $0x18] sm:$0xff] }
  0x76   : > { %615 = vmatmul.bf16.vlgmr.msra.gmra.mxu1 %v1073_v32 }
  0x78   : > { %627 = vmatpush.bf16.msra.mxu2 %v986_v6 }
  0x7c   : > { %628 = vmatpush.bf16.msra.mxu2 %v978_v11 }
  0x7f   : > { %629 = vmatmul.bf16.vlgmr.msra.gmra.mxu2 %v1073_v32 }
  0xf2   : > { %v495_v37 = vpop.f32.mrf.mxu0 }
  0xf3   : > { %v616_v35 = vpop.f32.mrf.mxu1  ;;  %v496_v48 = vadd.f32 %v1192_v44, %v495_v37  ;;  %v1099_v37 = vld [vmem:[#allocation10 + $0x8] sm:$0xff] }
  0xf4   : > { %v617_v38 = vadd.f32 %v616_v35, %v517_v36 }
  0xf5   : > { %v635_v49 = vpack.c.bf16 %v496_v48, %v496_v48 }
  0xf6   : > { %v636_v40 = vpack.c.bf16 %v617_v38, %v617_v38 }
  0xf8   : > { %v642_v45 = vunpack.c.l.b16 %v636_v40 }
  0xfa   : > { %v497_v42 = vpop.f32.mrf.mxu0 }
  0xfb   : > { %v618_v39 = vpop.f32.mrf.mxu1  ;;  %v1098_v42 = vld [vmem:[#allocation10] sm:$0xff] }
  0xfc   : > { %v619_v41 = vadd.f32 %v618_v39, %v517_v36 }
  0xfe   : > { %v637_v43 = vpack.c.bf16 %v619_v41, %v619_v41 }
 0x100   : > { %v643_v46 = vunpack.c.l.b16 %v637_v43 }
 0x102   : > { %v644_v47 = vpack.c.b16 %v643_v46, %v642_v45  ;;  %v630_v18 = vpop.f32.mrf.mxu2  ;;  %v1193_v46 = vld [vmem:[%s1712_s7] ss:$0 sm:$0xff] }
 0x103   : > { %v631_v20 = vadd.f32 %v630_v18, %v518_v19 }
 0x104   : > { %653 = vmatpush.bf16.xpose.msrb.mxu0 %v644_v47 }
 0x105   : > { %v638_v21 = vpack.c.bf16 %v631_v20, %v631_v20 }
 0x107   : > { %v677_v24 = vunpack.c.l.b16 %v638_v21 }
 0x10a   : > { %v632_v22 = vpop.f32.mrf.mxu2 }
 0x10b   : > { %654 = vmatmul.bf16.vlgmr.msrb.gmra.mxu0 %v635_v49  ;;  %v633_v23 = vadd.f32 %v632_v22, %v518_v19 }
 0x10d   : > { %v639_v25 = vpack.c.bf16 %v633_v23, %v633_v23 }
 0x10f   : > { %v678_v26 = vunpack.c.l.b16 %v639_v25 }
 0x111   : > { %v679_v27 = vpack.c.b16 %v678_v26, %v677_v24 }
 0x113   : > { %691 = vmatpush.bf16.msra.mxu3 %v679_v27 }
 0x117   : > { %766 = vmatpush.bf16.msrb.mxu3 %v1105_v28 }
 0x11b   : > { %767 = vmatpush.bf16.msrb.mxu3 %v1104_v29 }
 0x11f   : > { %768 = vmatpush.bf16.msrb.mxu3 %v1103_v30 }
 0x123   : > { %769 = vmatpush.bf16.msrb.mxu3 %v1102_v31 }
 0x127   : > { %770 = vmatpush.bf16.msrb.mxu3 %v1101_v33 }
 0x12b   : > { %771 = vmatpush.bf16.msrb.mxu3 %v1100_v34 }
 0x12f   : > { %772 = vmatpush.bf16.msrb.mxu3 %v1099_v37 }
 0x133   : > { %773 = vmatpush.bf16.msrb.mxu3 %v1098_v42 }
 0x188   : > { %v655_v7 = vpop.f32.mrf.mxu0 }
 0x189   : > { %v660_v10 = vsel %vm659_vm0, %v655_v7, -inf }
 0x18a   : > { %661 = vmax.xlane.f32.xlu0 %v660_v10 }
 0x190   : > { %v657_v12 = vpop.f32.mrf.mxu0 }
 0x1fd   : > { %v662_v13 = vpop.xlane.xlu0 %661 }
 0x1fe   : > { %v663_v14 = vsub.f32 %v655_v7, %v662_v13 }
 0x200   : > { %v664_v15 = vmul.f32 1.442695, %v663_v14 }
 0x202   : > { %1194 = vpow2.f32 %v664_v15 }
 0x208   : > { %v1195_v16 = vpop.eup %1194 }
 0x209   : > { %v666_v17 = vsel %vm659_vm0, %v1195_v16, 0.0 }
 0x20a   : > { %667 = vadd.xlane.f32.xlu0 %v666_v17 }
 0x27d   : > { %v668_v32 = vpop.xlane.xlu0 %667 }
 0x27e   : > { %1196 = vrcp.f32 %v668_v32 }
 0x284   : > { %v1197_v35 = vpop.eup %1196 }
 0x285   : > { %v670_v36 = vmul.f32 %v1197_v35, %v668_v32 }
 0x287   : > { %v671_v38 = vsub.f32 2.0, %v670_v36 }
 0x289   : > { %v672_v39 = vmul.f32 %v1197_v35, %v671_v38 }
 0x28b   : > { %v673_v40 = vmul.f32 %v1195_v16, %v672_v39 }
 0x28d   : > { %v674_v41 = vpack.c.bf16 %v673_v40, %v673_v40 }
 0x28f   : > { %1035 = vmatmul.msk.bf16.vlgmr.msra.gmra.mxu3 %vm659_vm0, %v674_v41 }
 0x312   : > { %v693_v43 = vpop.f32.mrf.mxu3 }
 0x313   : > { %v697_v44 = vpack.c.bf16 %v693_v43, %v693_v43 }
 0x315   : > { %774 = vmatmul.bf16.vlgmr.msrb.gmra.mxu3 %v697_v44 }
 0x31a   : > { %v695_v45 = vpop.f32.mrf.mxu3 }
 0x398   : > { %v775_v47 = vpop.f32.mrf.mxu3 }
 0x399   : > { %v776_v48 = vadd.f32 %v1193_v46, %v775_v47 }
 0x39b   : > { %779 = vst [vmem:[%s413_s21] sm:$0xff] %v776_v48 }
 0x39c   : > { %1375 = shalt.err (!%p1372_p9)
}
 0x39d   : > { %1122 = dma.vmem_to_hbm [thread:$0]  (%p1569_p7), %s794_s25, 128, %s796_s24, %s781_s10  }
 0x3a0   : > { %v777_v49 = vpop.f32.mrf.mxu3 }
 0x3a1 PF: > { %s807_s14 = sand.u32 1, %s1414_s27   ;;  %p1739_p12 = scmp.ge.s32.totalorder %s1426_s30, 2 }
 0x3a2   : > { %s808_s20 = scalar_lea.sflag [#allocation4], %s807_s14 }
 0x3a3   : > { %p1142_p13 = pnand %p1739_p12, %p1515_p6 }
 0x3a5   : > { %p1143_p0 = pneg %p1142_p13 }
 0x3a7   : > { %1409 = dma.done.wait (%p1143_p0), %s808_s20, 128  }
 0x3a8   : > { %1411 = vsyncadd (%p1143_p0), %s808_s20, 4294967168  ;;  %s1740_s30 = sld [smem:[#allocation19_spill]]  ;;  %s1743_s27 = smov %s1418_s28 }
 0x3a9   : > { %s1741_s6 = sld [smem:[#allocation17_spill]] }
 0x3aa   : > { %s1742_s29 = sld [smem:[#allocation20_spill]] }
 0x3ae   : > { %p25_p3 = scmp.ge.s32.totalorder %s1740_s30, 4  }
 0x3af   : > { %s1744_s28 = smov %s1741_s6 }
 0x3b0   :  { %27 = sbr.rel (!%p25_p3) target bundleno = 12 (0xc), region = 122 }
 0x3b5   :  { %814 = vsyncpa [#allocation3], 1 }
 0x3b6   :  { %816 = vsyncpa [#allocation3 + $0x1], 1 }
 0x3b7   :  { %817 = vsyncpa [#allocation6], 1 }
 0x3b8   :  { %819 = vsyncpa [#allocation6 + $0x1], 1 }
 0x3b9   :  { %820 = vsyncpa [#allocation9], 1 }
 0x3ba   :  { %821 = vsyncpa [#allocation4], 1 }
 0x3bb   :  { %823 = vsyncpa [#allocation4 + $0x1], 1 }

</bundles_post_ra>
